<compile_context>
chip_gen: v7x
topology: tpu7x:2x2x1
jax: 0.10.0
libtpu: 0.0.40
codegen_flags: <defaults>
</compile_context>

<pallas_src>
import math
import numpy as np
import jax
import jax.numpy as jnp
from jax.experimental import pallas as pl
from jax.experimental.pallas import tpu as pltpu


def _round_up(n: int, m: int) -> int:
    return ((n + m - 1) // m) * m


def _cdiv(a: int, b: int) -> int:
    return -(-a // b)


# -----------------------------------------------------------------------------
# Kernel: one batch tile of the fused 3-layer MLP encoder.
#   h1 = relu(x @ w1 + b1)
#   h2 = relu(h1 @ w2 + b2)
#   mv = relu(h2 @ w3 + b3)     (w3 columns already ordered [mean | logvar])
# Weights stay resident in VMEM across the batch grid (constant index_map);
# only the x / out tiles stream HBM<->VMEM with the auto-pipeline.
# NOTE: the six resident weight/bias inputs are still double-buffered by the
# auto-pipeline (~2x footprint) — accounted for in the VMEM budget below.
# -----------------------------------------------------------------------------
def encoder_kernel(x_ref, w1_ref, b1_ref, w2_ref, b2_ref, w3_ref, b3_ref, out_ref):
    wdt = w1_ref.dtype
    x = x_ref[...].astype(wdt)                 # in-kernel cast (free VPU filler)
    h1 = jnp.dot(x, w1_ref[...], preferred_element_type=jnp.float32) + b1_ref[...]
    h1 = jnp.maximum(h1, 0.0)                  # bias/ReLU in f32
    h2 = jnp.dot(h1.astype(wdt), w2_ref[...],
                 preferred_element_type=jnp.float32) + b2_ref[...]
    h2 = jnp.maximum(h2, 0.0)
    mv = jnp.dot(h2.astype(wdt), w3_ref[...],
                 preferred_element_type=jnp.float32) + b3_ref[...]
    out_ref[...] = jnp.maximum(mv, 0.0).astype(out_ref.dtype)


def init_params(key, embed_dim, latent_dim, seq_size):
    """PyTorch-layout params (interleaved mean/logvar cols in lin3),
    uniform(-1/sqrt(fan_in), +1/sqrt(fan_in)) like nn.Linear."""
    nc = embed_dim
    hidden_dim = int(nc * 2)
    in_dim = nc * seq_size
    out_dim = latent_dim * 2

    def lin(k, fan_in, fan_out):
        kw, kb = jax.random.split(k)
        bound = 1.0 / math.sqrt(fan_in)
        w = jax.random.uniform(kw, (fan_in, fan_out), jnp.float32, -bound, bound)
        b = jax.random.uniform(kb, (1, fan_out), jnp.float32, -bound, bound)
        return w, b

    k1, k2, k3 = jax.random.split(key, 3)
    w1, b1 = lin(k1, in_dim, hidden_dim)
    w2, b2 = lin(k2, hidden_dim, hidden_dim)
    w3, b3 = lin(k3, hidden_dim, out_dim)
    return (w1, b1, w2, b2, w3, b3)


def prepare_params(params, *, matmul_dtype=jnp.bfloat16):
    """One-time (init-time) repack of PyTorch-layout params:
       - de-interleave lin3 cols so mean -> [0:latent), logvar -> [latent:2*latent)
       - pad HIDDEN/OUTPUT feature dims up to lane-dense widths (x's input dim is
         left exactly at in_dim: w1 keeps only in_dim rows so x needs no padding)
       - cast weights to `matmul_dtype` (bf16 default; f32 available); biases f32.
    """
    w1, b1, w2, b2, w3, b3 = params
    in_dim, hidden_dim = w1.shape
    out_dim = w3.shape[1]
    latent_dim = out_dim // 2

    hid_p = _round_up(hidden_dim, 128)
    # Exact output width when out_dim >= 128 (minimal HBM write bytes); below
    # 128 keep a single lane-dense 128-wide slab (unmasked vst).
    out_cols = out_dim if out_dim >= 128 else 128

    perm = np.concatenate([np.arange(0, out_dim, 2), np.arange(1, out_dim, 2)])
    w3 = w3[:, perm]
    b3 = b3[:, perm]

    def pad2(a, rows, cols, dtype):
        return jnp.pad(a, ((0, rows - a.shape[0]), (0, cols - a.shape[1]))).astype(dtype)

    prepared = (
        pad2(w1, in_dim, hid_p, matmul_dtype), pad2(b1, 1, hid_p, jnp.float32),
        pad2(w2, hid_p, hid_p, matmul_dtype), pad2(b2, 1, hid_p, jnp.float32),
        pad2(w3, hid_p, out_cols, matmul_dtype), pad2(b3, 1, out_cols, jnp.float32),
    )
    meta = dict(in_dim=in_dim, hidden_dim=hidden_dim, out_dim=out_dim,
                latent_dim=latent_dim, hid_p=hid_p, out_cols=out_cols)
    return prepared, meta


def _choose_batch_tile(batch: int, tile_m: int):
    """Pick the batch tile. Big tiles amortize per-step overhead; prefer an even
    grid >= 2 once batch is large enough so v7x's 2 TensorCores split evenly
    (v5e/v6e have a single TC and only pay one extra ~0.35 us grid step)."""
    tm = _round_up(min(tile_m, batch), 8)
    grid_m = _cdiv(batch, tm)
    if grid_m == 1 and batch >= 256:
        tm = _round_up(_cdiv(batch, 2), 8)
        grid_m = _cdiv(batch, tm)
    elif grid_m > 1 and grid_m % 2 == 1:
        tm_alt = _round_up(_cdiv(batch, grid_m + 1), 8)
        if _cdiv(batch, tm_alt) % 2 == 0:
            tm, grid_m = tm_alt, _cdiv(batch, tm_alt)
    return tm, grid_m


def _vmem_limit_bytes(vmem_need: int) -> int:
    """Scoped-VMEM request with per-generation ceiling (leave ~25% headroom for
    compiler-internal scratch; v7x only has 64 MiB/TC, v5e/v6e have 128 MiB)."""
    try:
        cap = int(pltpu.get_tpu_info().vmem_capacity_bytes)
    except Exception:
        cap = 64 * 1024 * 1024
    ceiling = (cap * 3) // 4
    return int(min(ceiling, max(16 * 1024 * 1024, 2 * vmem_need)))


def encoder_forward(x, prepared_params, meta, *, tile_m=512, out_dtype=jnp.float32):
    """x: (batch, embed_dim, seq_size). Returns (mean, logvar), each (batch, latent_dim)."""
    w1p, b1p, w2p, b2p, w3p, b3p = prepared_params
    in_dim, latent_dim = meta["in_dim"], meta["latent_dim"]
    hid_p, out_cols = meta["hid_p"], meta["out_cols"]

    batch = x.shape[0]
    assert math.prod(x.shape[1:]) == in_dim

    tm, grid_m = _choose_batch_tile(batch, tile_m)

    # Pure reshape view; no padding, no wrapper-side dtype cast, no copies.
    x_flat = x.reshape(batch, in_dim)

    # x / out tiles stream over the batch grid; weights are resident (block (0,0)).
    x_spec = pl.BlockSpec((tm, in_dim), lambda i: (i, 0))

    def resident(rows, cols):
        return pl.BlockSpec((rows, cols), lambda i: (0, 0))

    wbytes = jnp.dtype(w1p.dtype).itemsize
    xbytes = jnp.dtype(x.dtype).itemsize
    obytes = jnp.dtype(out_dtype).itemsize
    # Budget: double-buffered x/out streams, double-buffered resident
    # weights/biases (auto-pipeline still allocates 2 buffers even for a
    # constant index_map), plus f32 intermediates.
    vmem_need = (2 * tm * in_dim * xbytes
                 + 2 * (in_dim * hid_p + hid_p * hid_p + hid_p * out_cols) * wbytes
                 + 2 * (2 * hid_p + out_cols) * 4
                 + 2 * tm * out_cols * obytes
                 + 2 * tm * hid_p * 4)
    vmem_limit = _vmem_limit_bytes(vmem_need)

    flops = 2 * batch * (in_dim * hid_p + hid_p * hid_p + hid_p * out_cols)
    bytes_accessed = (batch * in_dim * xbytes
                      + (in_dim * hid_p + hid_p * hid_p + hid_p * out_cols) * wbytes
                      + (2 * hid_p + out_cols) * 4
                      + batch * out_cols * obytes)

    mean_var = pl.pallas_call(
        encoder_kernel,
        out_shape=jax.ShapeDtypeStruct((batch, out_cols), out_dtype),
        grid=(grid_m,),
        in_specs=[
            x_spec,
            resident(w1p.shape[0], hid_p), resident(1, hid_p),
            resident(hid_p, hid_p), resident(1, hid_p),
            resident(hid_p, out_cols), resident(1, out_cols),
        ],
        out_specs=pl.BlockSpec((tm, out_cols), lambda i: (i, 0)),
        compiler_params=pltpu.CompilerParams(
            dimension_semantics=("parallel",),     # megacore-shardable batch axis
            vmem_limit_bytes=vmem_limit),
        cost_estimate=pl.CostEstimate(flops=int(flops), transcendentals=0,
                                      bytes_accessed=int(bytes_accessed)),
    )(x_flat, w1p, b1p, w2p, b2p, w3p, b3p)

    # Columns are already [mean | logvar]: zero-cost contiguous slices.
    mean = mean_var[:, :latent_dim]
    logvar = mean_var[:, latent_dim:2 * latent_dim]
    return mean, logvar


def _reference(x, params):
    """Plain-JAX replica of the PyTorch forward (interleaved lin3 columns).
    Note: ReLU on mean/logvar matches the module spec (unusual for a VAE, but kept)."""
    w1, b1, w2, b2, w3, b3 = params
    batch = x.shape[0]
    latent_dim = w3.shape[1] // 2
    xf = x.reshape(batch, -1)
    h = jnp.maximum(xf @ w1 + b1, 0.0)
    h = jnp.maximum(h @ w2 + b2, 0.0)
    mv = jnp.maximum(h @ w3 + b3, 0.0).reshape(batch, latent_dim, 2)
    return mv[..., 0], mv[..., 1]


if __name__ == "__main__":
    embed_dim = 4      # nc
    seq_size = 8
    latent_dim = 16

    key = jax.random.PRNGKey(0)
    k_params, k_x1, k_x2 = jax.random.split(key, 3)
    params = init_params(k_params, embed_dim, latent_dim, seq_size)

    # --- f32 matmul path, tiny batch (single ragged tile) ----------------------
    prepared_f32, meta = prepare_params(params, matmul_dtype=jnp.float32)
    x_small = jax.random.normal(k_x1, (2, embed_dim, seq_size), jnp.float32)
    mean, logvar = encoder_forward(x_small, prepared_f32, meta)
    jax.block_until_ready((mean, logvar))
    mean_r, logvar_r = _reference(x_small, params)
    assert mean.shape == (2, latent_dim) and logvar.shape == (2, latent_dim)
    assert jnp.allclose(mean, mean_r, atol=1e-5)
    assert jnp.allclose(logvar, logvar_r, atol=1e-5)

    # --- f32 path, larger batch (2-tile grid, ragged last tile, no padding) ----
    x_big = jax.random.normal(k_x2, (300, embed_dim, seq_size), jnp.float32)
    mean_b, logvar_b = encoder_forward(x_big, prepared_f32, meta)
    jax.block_until_ready((mean_b, logvar_b))
    mean_br, logvar_br = _reference(x_big, params)
    assert jnp.allclose(mean_b, mean_br, atol=1e-5)
    assert jnp.allclose(logvar_b, logvar_br, atol=1e-5)

    # --- bf16 default path (in-kernel cast, bf16 output stream) ----------------
    prepared_bf16, meta16 = prepare_params(params)   # matmul_dtype defaults to bf16
    mean_h, logvar_h = encoder_forward(x_big, prepared_bf16, meta16,
                                       out_dtype=jnp.bfloat16)
    jax.block_until_ready((mean_h, logvar_h))
    assert jnp.allclose(mean_h.astype(jnp.float32), mean_br, atol=5e-2, rtol=5e-2)
    assert jnp.allclose(logvar_h.astype(jnp.float32), logvar_br, atol=5e-2, rtol=5e-2)

    print("KERNEL_OK")
</pallas_src>

<mosaic_0001>
module attributes {stable_mosaic.version = 11 : i64} {
  func.func @encoder_kernel(%arg0: i32, %arg1: memref<8x32xf32, #tpu.memory_space<vmem>>, %arg2: memref<32x128xf32, #tpu.memory_space<vmem>>, %arg3: memref<1x128xf32, #tpu.memory_space<vmem>>, %arg4: memref<128x128xf32, #tpu.memory_space<vmem>>, %arg5: memref<1x128xf32, #tpu.memory_space<vmem>>, %arg6: memref<128x128xf32, #tpu.memory_space<vmem>>, %arg7: memref<1x128xf32, #tpu.memory_space<vmem>>, %arg8: memref<8x128xf32, #tpu.memory_space<vmem>>) attributes {dimension_semantics = [#tpu.dimension_semantics<parallel>], iteration_bounds = array<i64: 1>, scalar_prefetch = 0 : i64, scratch_operands = 0 : i64, tpu.core_type = #tpu.core_type<tc>, window_params = [{transform_indices = @transform_0, window_bounds = array<i64: 8, 32>}, {pipeline_mode = #tpu.pipeline_mode<synchronous>, transform_indices = @transform_1, window_bounds = array<i64: 32, 128>}, {pipeline_mode = #tpu.pipeline_mode<synchronous>, transform_indices = @transform_2, window_bounds = array<i64: 1, 128>}, {pipeline_mode = #tpu.pipeline_mode<synchronous>, transform_indices = @transform_3, window_bounds = array<i64: 128, 128>}, {pipeline_mode = #tpu.pipeline_mode<synchronous>, transform_indices = @transform_4, window_bounds = array<i64: 1, 128>}, {pipeline_mode = #tpu.pipeline_mode<synchronous>, transform_indices = @transform_5, window_bounds = array<i64: 128, 128>}, {pipeline_mode = #tpu.pipeline_mode<synchronous>, transform_indices = @transform_6, window_bounds = array<i64: 1, 128>}, {transform_indices = @transform_7, window_bounds = array<i64: 8, 128>}]} {
    %c0 = arith.constant 0 : index
    %c0_0 = arith.constant 0 : index
    %0 = vector.load %arg1[%c0, %c0_0] : memref<8x32xf32, #tpu.memory_space<vmem>>, vector<8x32xf32>
    %c0_1 = arith.constant 0 : index
    %c0_2 = arith.constant 0 : index
    %1 = vector.load %arg2[%c0_1, %c0_2] : memref<32x128xf32, #tpu.memory_space<vmem>>, vector<32x128xf32>
    %cst = arith.constant dense<0.000000e+00> : vector<8x128xf32>
    %2 = tpu.matmul %0, %1, %cst {dimension_numbers = #tpu.dot_dimension_numbers<[1], [0], [0], [1], [0, 0, 1, 1], [], []>} : vector<8x32xf32>, vector<32x128xf32>, vector<8x128xf32> -> vector<8x128xf32>
    %c0_3 = arith.constant 0 : index
    %c0_4 = arith.constant 0 : index
    %3 = vector.load %arg3[%c0_3, %c0_4] : memref<1x128xf32, #tpu.memory_space<vmem>>, vector<1x128xf32>
    %4 = vector.broadcast %3 : vector<1x128xf32> to vector<8x128xf32>
    %5 = arith.addf %2, %4 : vector<8x128xf32>
    %cst_5 = arith.constant 0.000000e+00 : f32
    %6 = vector.broadcast %cst_5 : f32 to vector<8x128xf32>
    %7 = arith.maximumf %5, %6 : vector<8x128xf32>
    %c0_6 = arith.constant 0 : index
    %c0_7 = arith.constant 0 : index
    %8 = vector.load %arg4[%c0_6, %c0_7] : memref<128x128xf32, #tpu.memory_space<vmem>>, vector<128x128xf32>
    %cst_8 = arith.constant dense<0.000000e+00> : vector<8x128xf32>
    %9 = tpu.matmul %7, %8, %cst_8 {dimension_numbers = #tpu.dot_dimension_numbers<[1], [0], [0], [1], [0, 0, 1, 1], [], []>} : vector<8x128xf32>, vector<128x128xf32>, vector<8x128xf32> -> vector<8x128xf32>
    %c0_9 = arith.constant 0 : index
    %c0_10 = arith.constant 0 : index
    %10 = vector.load %arg5[%c0_9, %c0_10] : memref<1x128xf32, #tpu.memory_space<vmem>>, vector<1x128xf32>
    %11 = vector.broadcast %10 : vector<1x128xf32> to vector<8x128xf32>
    %12 = arith.addf %9, %11 : vector<8x128xf32>
    %cst_11 = arith.constant 0.000000e+00 : f32
    %13 = vector.broadcast %cst_11 : f32 to vector<8x128xf32>
    %14 = arith.maximumf %12, %13 : vector<8x128xf32>
    %c0_12 = arith.constant 0 : index
    %c0_13 = arith.constant 0 : index
    %15 = vector.load %arg6[%c0_12, %c0_13] : memref<128x128xf32, #tpu.memory_space<vmem>>, vector<128x128xf32>
    %cst_14 = arith.constant dense<0.000000e+00> : vector<8x128xf32>
    %16 = tpu.matmul %14, %15, %cst_14 {dimension_numbers = #tpu.dot_dimension_numbers<[1], [0], [0], [1], [0, 0, 1, 1], [], []>} : vector<8x128xf32>, vector<128x128xf32>, vector<8x128xf32> -> vector<8x128xf32>
    %c0_15 = arith.constant 0 : index
    %c0_16 = arith.constant 0 : index
    %17 = vector.load %arg7[%c0_15, %c0_16] : memref<1x128xf32, #tpu.memory_space<vmem>>, vector<1x128xf32>
    %18 = vector.broadcast %17 : vector<1x128xf32> to vector<8x128xf32>
    %19 = arith.addf %16, %18 : vector<8x128xf32>
    %cst_17 = arith.constant 0.000000e+00 : f32
    %20 = vector.broadcast %cst_17 : f32 to vector<8x128xf32>
    %21 = arith.maximumf %19, %20 : vector<8x128xf32>
    %c0_18 = arith.constant 0 : index
    %c0_19 = arith.constant 0 : index
    %22 = vector.load %arg8[%c0_18, %c0_19] : memref<8x128xf32, #tpu.memory_space<vmem>>, vector<8x128xf32>
    tpu.vector_store %arg8[%c0_18, %c0_19], %21 {strides = array<i32>} : memref<8x128xf32, #tpu.memory_space<vmem>>, vector<8x128xf32>,
    return
  }
  func.func @transform_0(%arg0: i32) -> (i32, i32) {
    %c0_i32 = arith.constant 0 : i32
    %c0_i32_0 = arith.constant 0 : i32
    return %arg0, %c0_i32 : i32, i32
  }
  func.func @transform_1(%arg0: i32) -> (i32, i32) {
    %c0_i32 = arith.constant 0 : i32
    %c0_i32_0 = arith.constant 0 : i32
    %c0_i32_1 = arith.constant 0 : i32
    return %c0_i32, %c0_i32_0 : i32, i32
  }
  func.func @transform_2(%arg0: i32) -> (i32, i32) {
    %c0_i32 = arith.constant 0 : i32
    %c0_i32_0 = arith.constant 0 : i32
    %c0_i32_1 = arith.constant 0 : i32
    return %c0_i32, %c0_i32_0 : i32, i32
  }
  func.func @transform_3(%arg0: i32) -> (i32, i32) {
    %c0_i32 = arith.constant 0 : i32
    %c0_i32_0 = arith.constant 0 : i32
    %c0_i32_1 = arith.constant 0 : i32
    return %c0_i32, %c0_i32_0 : i32, i32
  }
  func.func @transform_4(%arg0: i32) -> (i32, i32) {
    %c0_i32 = arith.constant 0 : i32
    %c0_i32_0 = arith.constant 0 : i32
    %c0_i32_1 = arith.constant 0 : i32
    return %c0_i32, %c0_i32_0 : i32, i32
  }
  func.func @transform_5(%arg0: i32) -> (i32, i32) {
    %c0_i32 = arith.constant 0 : i32
    %c0_i32_0 = arith.constant 0 : i32
    %c0_i32_1 = arith.constant 0 : i32
    return %c0_i32, %c0_i32_0 : i32, i32
  }
  func.func @transform_6(%arg0: i32) -> (i32, i32) {
    %c0_i32 = arith.constant 0 : i32
    %c0_i32_0 = arith.constant 0 : i32
    %c0_i32_1 = arith.constant 0 : i32
    return %c0_i32, %c0_i32_0 : i32, i32
  }
  func.func @transform_7(%arg0: i32) -> (i32, i32) {
    %c0_i32 = arith.constant 0 : i32
    %c0_i32_0 = arith.constant 0 : i32
    return %arg0, %c0_i32 : i32, i32
  }
}

</mosaic_0001>

<bundles_post_ra>
// kernel: tpu_custom_call.1
= control target key start
LH: loop header
LB: loop body
LE: loop exit
PB: predicated region body
PF: predicated region fallthrough
CT: control target
= control target key end

     0   :  { %12 = vsyncpa [#allocation3], 0  ;;  %s849_s0 = inlined_call_operand.hbm [shape: f32[2,32], index: 0, kind: input, shape index: {}]   ;;  %s850_s1 = inlined_call_operand.hbm [shape: f32[32,128], index: 1, kind: input, shape index: {}]   ;;  %s851_s2 = inlined_call_operand.vmem [shape: f32[1,128], index: 2, kind: input, shape index: {}]   ;;  %s852_s3 = inlined_call_operand.hbm [shape: f32[128,128], index: 3, kind: input, shape index: {}]   ;;  %s853_s4 = inlined_call_operand.vmem [shape: f32[1,128], index: 4, kind: input, shape index: {}]   ;;  %s854_s5 = inlined_call_operand.hbm [shape: f32[128,128], index: 5, kind: input, shape index: {}]   ;;  %s855_s6 = inlined_call_operand.vmem [shape: f32[1,128], index: 6, kind: input, shape index: {}]   ;;  %s856_s7 = inlined_call_operand.hbm [shape: f32[2,128], index: 7, kind: output, shape index: {}]  }
   0x1   :  { %13 = vsyncpa [#allocation6], 0 }
   0x2   :  { %14 = vsyncpa [#allocation9], 0 }
   0x3   :  { %15 = vsyncpa [#allocation4], 0 }
   0x4   :  { %20 = vsyncadd [#allocation3], 96  ;;  %s685_s24 = smov [#allocation5]   ;;  %s567_s28 = scalar_lea.hbm %s850_s1, 512 }
   0x5   :  { %s33_s25 = sshll.u32 %s685_s24, 4  ;;  %p568_p0 = scmp.ne.s32.totalorder %s850_s1, %s567_s28  ;;  %s34_s25 = int_to_ptr.vmem [resolvable:$true] %s33_s25 }
   0x6   :  { %p571_p1 = scmp.lt.u32.totalorder %s567_s28, %s850_s1 }
   0x8   :  { %p573_p2 = pnand %p571_p1, %p568_p0 }
   0xa   :  { %576 = shalt.err (!%p573_p2)
}
   0xb   :  { %s577_s10 = scalar_lea.vmem %s34_s25, 512  ;;  %p582_p4 = scmp.lt.s32.totalorder %s34_s25, %s34_s25 }
   0xc   :  { %p578_p3 = scmp.ne.s32.totalorder %s34_s25, %s577_s10  ;;  %p583_p5 = scmp.lt.s32.totalorder %s577_s10, %s577_s10 }
   0xe   :  { %p584_p6 = por %p583_p5, %p582_p4 }
  0x10   :  { %p585_p7 = pnand %p584_p6, %p578_p3 }
  0x12   :  { %588 = shalt.err (!%p585_p7)
}
  0x13   :  { %s686_s11 = smov 128   ;;  %s687_s12 = smov 8  }
  0x14   :  { %39 = dma.hbm_to_vmem [thread:$0]  %s850_s1, 512, %s34_s25, [#allocation6], %s686_s11, %s686_s11, %s687_s12  }
  0x15   :  { %s688_s15 = smov [#allocation2]   ;;  %s589_s19 = scalar_lea.hbm %s849_s0, 32 }
  0x16   :  { %s21_s16 = sshll.u32 %s688_s15, 4  ;;  %p590_p8 = scmp.ne.s32.totalorder %s849_s0, %s589_s19  ;;  %s22_s16 = int_to_ptr.vmem [resolvable:$true] %s21_s16 }
  0x17   :  { %p593_p9 = scmp.lt.u32.totalorder %s589_s19, %s849_s0 }
  0x19   :  { %p595_p10 = pnand %p593_p9, %p590_p8 }
  0x1b   :  { %598 = shalt.err (!%p595_p10)
}
  0x1c   :  { %s599_s24 = scalar_lea.vmem %s22_s16, 32  ;;  %s603_s1 = scalar_lea.vmem %s22_s16, 128 }
  0x1d   :  { %p600_p11 = scmp.ne.s32.totalorder %s22_s16, %s599_s24  ;;  %p604_p12 = scmp.lt.s32.totalorder %s22_s16, %s22_s16 }
  0x1e   :  { %p605_p13 = scmp.lt.s32.totalorder %s603_s1, %s599_s24 }
  0x20   :  { %p606_p0 = por %p605_p13, %p604_p12 }
  0x22   :  { %p607_p1 = pnand %p606_p0, %p600_p11 }
  0x24   :  { %610 = shalt.err (!%p607_p1)
}
  0x25   :  { %s689_s25 = smov 32   ;;  %s690_s26 = smov 2  }
  0x26   :  { %27 = dma.hbm_to_vmem [thread:$0]  %s849_s0, 32, %s22_s16, [#allocation3], %s689_s25, %s689_s25, %s690_s26  }
  0x27   :  { %s691_s29 = smov [#allocation7]   ;;  %s692_s8 = smov [#allocation8]  }
  0x28   :  { %s47_s30 = sshll.u32 %s691_s29, 4  ;;  %s61_s9 = sshll.u32 %s692_s8, 4  ;;  %s48_s30 = int_to_ptr.vmem [resolvable:$true] %s47_s30  ;;  %s767_s9 = int_to_ptr.vmem [resolvable:$true] %s61_s9 }
  0x29   :  { %s611_s14 = scalar_lea.hbm %s852_s3, 2048 }
  0x2a   :  { %p612_p2 = scmp.ne.s32.totalorder %s852_s3, %s611_s14  ;;  %p615_p3 = scmp.lt.u32.totalorder %s611_s14, %s852_s3 }
  0x2c   :  { %p617_p4 = pnand %p615_p3, %p612_p2 }
  0x2e   :  { %620 = shalt.err (!%p617_p4)
}
  0x2f   :  { %s621_s0 = scalar_lea.vmem %s48_s30, 2048  ;;  %p626_p6 = scmp.lt.s32.totalorder %s48_s30, %s48_s30 }
  0x30   :  { %p622_p5 = scmp.ne.s32.totalorder %s48_s30, %s621_s0  ;;  %p627_p7 = scmp.lt.s32.totalorder %s621_s0, %s621_s0 }
  0x32   :  { %p628_p8 = por %p627_p7, %p626_p6 }
  0x34   :  { %p629_p9 = pnand %p628_p8, %p622_p5 }
  0x36   :  { %632 = shalt.err (!%p629_p9)
}
  0x37   :  { %53 = dma.hbm_to_vmem [thread:$0]  %s852_s3, 2048, %s48_s30, [#allocation6], %s686_s11, %s686_s11, %s687_s12  }
  0x38   :  { %s633_s23 = scalar_lea.hbm %s854_s5, 2048 }
  0x39   :  { %p634_p10 = scmp.ne.s32.totalorder %s854_s5, %s633_s23  ;;  %p637_p11 = scmp.lt.u32.totalorder %s633_s23, %s854_s5 }
  0x3b   :  { %p639_p12 = pnand %p637_p11, %p634_p10 }
  0x3d   :  { %642 = shalt.err (!%p639_p12)
}
  0x3e   :  { %s643_s29 = scalar_lea.vmem %s767_s9, 2048  ;;  %p648_p0 = scmp.lt.s32.totalorder %s767_s9, %s767_s9 }
  0x3f   :  { %p644_p13 = scmp.ne.s32.totalorder %s767_s9, %s643_s29  ;;  %p649_p1 = scmp.lt.s32.totalorder %s643_s29, %s643_s29 }
  0x41   :  { %p650_p2 = por %p649_p1, %p648_p0 }
  0x43   :  { %p651_p3 = pnand %p650_p2, %p644_p13 }
  0x45   :  { %654 = shalt.err (!%p651_p3)
}
  0x46   :  { %67 = dma.hbm_to_vmem [thread:$0]  %s854_s5, 2048, %s767_s9, [#allocation9], %s686_s11, %s686_s11, %s687_s12  }
  0x47   :  { %677 = dma.done.wait [#allocation3], 128  }
  0x48   :  { %678 = vsyncadd [#allocation3], 4294967168 }
  0x49   :  { %679 = dma.done.wait [#allocation6], 2560  }
  0x4a   :  { %680 = vsyncadd [#allocation6], 4294964736 }
  0x4b   :  { %681 = dma.done.wait [#allocation9], 2048  }
  0x4c   :  { %682 = vsyncadd [#allocation9], 4294965248  ;;  %v693_v0 = vmov 0.0|0.0   ;;  %vm694_vm0 = vmmov 0   ;;  %v695_v1 = vmov 0.0   ;;  %v83_v2 = vld [vmem:[#allocation5] sm:$0xff] }
  0x4d   :  { %501 = vmatprep.subr.bf16.mxu0 %v693_v0  ;;  %428 = vmatprep.mubr.msk.f32.mxu0 %vm694_vm0, %v695_v1  ;;  %v84_v3 = vld [vmem:[#allocation5 + $0x8] sm:$0xff]  ;;  %v85_v4 = vld [vmem:[#allocation5 + $0x10] sm:$0xff]  ;;  %v86_v6 = vld [vmem:[#allocation5 + $0x18] sm:$0xff]  ;;  %vm94_vm1 = vcmask 261120  }
  0x4e   :  { %507 = vmatprep.subr.bf16.mxu1 %v693_v0  ;;  %463 = vmatprep.mubr.msk.f32.mxu1 %vm694_vm0, %v695_v1  ;;  %v502_v5 = vpack.c.bf16 %v84_v3, %v83_v2  ;;  %v169_v7 = vld [vmem:[#allocation7] sm:$0xff]  ;;  %v170_v8 = vld [vmem:[#allocation7 + $0x8] sm:$0xff]  ;;  %v171_v9 = vld [vmem:[#allocation7 + $0x10] sm:$0xff]  ;;  %v505_v11 = vpack.c.bf16 %v86_v6, %v85_v4 }
  0x4f   :  { %v172_v10 = vld [vmem:[#allocation7 + $0x18] sm:$0xff]  ;;  %v508_v12 = vpack.c.bf16 %v170_v8, %v169_v7  ;;  %v173_v14 = vld [vmem:[#allocation7 + $0x20] sm:$0xff]  ;;  %v174_v15 = vld [vmem:[#allocation7 + $0x28] sm:$0xff] }
  0x50   :  { %503 = vmatpush3.bf16.msra.mxu0 %v502_v5  ;;  %v511_v13 = vpack.c.bf16 %v172_v10, %v171_v9  ;;  %v82_v16 = vld [vmem:[#allocation2] sm:$0xff]  ;;  %v514_v17 = vpack.c.bf16 %v174_v15, %v173_v14  ;;  %v175_v18 = vld [vmem:[#allocation7 + $0x30] sm:$0xff]  ;;  %v177_v21 = vld [vmem:[#allocation7 + $0x40] sm:$0xff] }
  0x51   :  { %504 = vmatprep.subr.bf16.mxu0 %v693_v0  ;;  %509 = vmatpush3.bf16.msra.mxu1 %v508_v12  ;;  %v176_v19 = vld [vmem:[#allocation7 + $0x38] sm:$0xff]  ;;  %v178_v22 = vld [vmem:[#allocation7 + $0x48] sm:$0xff]  ;;  %v179_v24 = vld [vmem:[#allocation7 + $0x50] sm:$0xff] }
  0x52   :  { %510 = vmatprep.subr.bf16.mxu1 %v693_v0  ;;  %v517_v20 = vpack.c.bf16 %v176_v19, %v175_v18  ;;  %v520_v23 = vpack.c.bf16 %v178_v22, %v177_v21  ;;  %v180_v25 = vld [vmem:[#allocation7 + $0x58] sm:$0xff]  ;;  %v181_v27 = vld [vmem:[#allocation7 + $0x60] sm:$0xff]  ;;  %v182_v28 = vld [vmem:[#allocation7 + $0x68] sm:$0xff] }
  0x53   :  { %v523_v26 = vpack.c.bf16 %v180_v25, %v179_v24  ;;  %v526_v29 = vpack.c.bf16 %v182_v28, %v181_v27  ;;  %v183_v30 = vld [vmem:[#allocation7 + $0x70] sm:$0xff]  ;;  %v184_v31 = vld [vmem:[#allocation7 + $0x78] sm:$0xff]  ;;  %v263_v33 = vld [vmem:[#allocation8] sm:$0xff] }
  0x54   :  { %506 = vmatpush3.bf16.msra.mxu0 %v505_v11  ;;  %v529_v32 = vpack.c.bf16 %v184_v31, %v183_v30  ;;  %v264_v34 = vld [vmem:[#allocation8 + $0x8] sm:$0xff]  ;;  %v265_v35 = vld [vmem:[#allocation8 + $0x10] sm:$0xff]  ;;  %v266_v37 = vld [vmem:[#allocation8 + $0x18] sm:$0xff] }
  0x55   :  { %531 = vmatprep.subr.bf16.mxu0 %v693_v0  ;;  %512 = vmatpush3.bf16.msra.mxu1 %v511_v13  ;;  %v532_v36 = vpack.c.bf16 %v264_v34, %v263_v33  ;;  %v535_v38 = vpack.c.bf16 %v266_v37, %v265_v35  ;;  %v267_v39 = vld [vmem:[#allocation8 + $0x20] sm:$0xff]  ;;  %v268_v40 = vld [vmem:[#allocation8 + $0x28] sm:$0xff]  ;;  %v269_v42 = vld [vmem:[#allocation8 + $0x30] sm:$0xff] }
  0x56   :  { %513 = vmatprep.subr.bf16.mxu1 %v693_v0  ;;  %v538_v41 = vpack.c.bf16 %v268_v40, %v267_v39  ;;  %v270_v43 = vld [vmem:[#allocation8 + $0x38] sm:$0xff]  ;;  %v271_v45 = vld [vmem:[#allocation8 + $0x40] sm:$0xff]  ;;  %v272_v46 = vld [vmem:[#allocation8 + $0x48] sm:$0xff] }
  0x57   :  { %429 = vmatmul.mubr.msk.f32.vlgmr.msra.gmra.mrb[0].mxu0 %vm94_vm1, %v82_v16  ;;  %v541_v44 = vpack.c.bf16 %v270_v43, %v269_v42  ;;  %v544_v47 = vpack.c.bf16 %v272_v46, %v271_v45  ;;  %v273_v48 = vld [vmem:[#allocation8 + $0x50] sm:$0xff]  ;;  %v274_v49 = vld [vmem:[#allocation8 + $0x58] sm:$0xff]  ;;  %v275_v51 = vld [vmem:[#allocation8 + $0x60] sm:$0xff] }
  0x58   :  { %498 = vmatprep.mubr.msk.f32.mxu0 %vm694_vm0, %v695_v1  ;;  %533 = vmatpush3.bf16.msra.mxu0 %v532_v36  ;;  %v547_v50 = vpack.c.bf16 %v274_v49, %v273_v48  ;;  %v276_v52 = vld [vmem:[#allocation8 + $0x68] sm:$0xff]  ;;  %v377_v54 = vld [vmem:[%s851_s2] ss:$0 sm:$0xff]  ;;  %v277_v59 = vld [vmem:[#allocation8 + $0x70] sm:$0xff] }
  0x59   :  { %515 = vmatpush3.bf16.msra.mxu1 %v514_v17  ;;  %534 = vmatprep.subr.bf16.mxu0 %v693_v0  ;;  %v550_v53 = vpack.c.bf16 %v276_v52, %v275_v51  ;;  %v278_v60 = vld [vmem:[#allocation8 + $0x78] sm:$0xff] }
  0x5a   :  { %516 = vmatprep.subr.bf16.mxu1 %v693_v0  ;;  %v553_v61 = vpack.c.bf16 %v278_v60, %v277_v59  ;;  %v379_v62 = vld [vmem:[%s853_s4] ss:$0 sm:$0xff] }
  0x5b   :  { %v380_v3 = vld [vmem:[%s855_s6] ss:$0 sm:$0xff] }
  0x5c   :  { %536 = vmatpush3.bf16.msra.mxu0 %v535_v38 }
  0x5d   :  { %518 = vmatpush3.bf16.msra.mxu1 %v517_v20  ;;  %537 = vmatprep.subr.bf16.mxu0 %v693_v0 }
  0x5e   :  { %519 = vmatprep.subr.bf16.mxu1 %v693_v0 }
  0x60   :  { %539 = vmatpush3.bf16.msra.mxu0 %v538_v41 }
  0x61   :  { %521 = vmatpush3.bf16.msra.mxu1 %v520_v23  ;;  %540 = vmatprep.subr.bf16.mxu0 %v693_v0 }
  0x62   :  { %522 = vmatprep.subr.bf16.mxu1 %v693_v0 }
  0x64   :  { %542 = vmatpush3.bf16.msra.mxu0 %v541_v44 }
  0x65   :  { %524 = vmatpush3.bf16.msra.mxu1 %v523_v26  ;;  %543 = vmatprep.subr.bf16.mxu0 %v693_v0 }
  0x66   :  { %525 = vmatprep.subr.bf16.mxu1 %v693_v0 }
  0x68   :  { %545 = vmatpush3.bf16.msra.mxu0 %v544_v47 }
  0x69   :  { %527 = vmatpush3.bf16.msra.mxu1 %v526_v29  ;;  %546 = vmatprep.subr.bf16.mxu0 %v693_v0 }
  0x6a   :  { %528 = vmatprep.subr.bf16.mxu1 %v693_v0 }
  0x6c   :  { %548 = vmatpush3.bf16.msra.mxu0 %v547_v50 }
  0x6d   :  { %530 = vmatpush3.bf16.msra.mxu1 %v529_v32  ;;  %549 = vmatprep.subr.bf16.mxu0 %v693_v0 }
  0x70   :  { %551 = vmatpush3.bf16.msra.mxu0 %v550_v53 }
  0x71   :  { %552 = vmatprep.subr.bf16.mxu0 %v693_v0 }
  0x74   :  { %554 = vmatpush3.bf16.msra.mxu0 %v553_v61 }
 0x12a   :  { %v164_v55 = vpop.f32.mrb[0].mxu0 }
 0x12b   :  { %v165_v56 = vadd.f32 %v377_v54, %v164_v55  ;;  %v430_v57 = vpop.f32.mrb[1].mxu0 }
 0x12d   :  { %v168_v58 = vmax.f32 %v165_v56, 0.0 }
 0x12f   :  { %464 = vmatmul.mubr.f32.vlgmr.msra.gmra.mrb[0].mxu1 %v168_v58 }
 0x202   :  { %v258_v63 = vpop.f32.mrb[0].mxu1 }
 0x203   :  { %v259_v1 = vadd.f32 %v379_v62, %v258_v63  ;;  %v465_v0 = vpop.f32.mrb[1].mxu1 }
 0x205   :  { %v262_v2 = vmax.f32 %v259_v1, 0.0 }
 0x207   :  { %499 = vmatmul.mubr.f32.vlgmr.msra.gmra.mrb[2].mxu0 %v262_v2 }
 0x2da   :  { %v352_v4 = vpop.f32.mrb[2].mxu0 }
 0x2db   :  { %v353_v5 = vadd.f32 %v380_v3, %v352_v4  ;;  %v500_v6 = vpop.f32.mrb[3].mxu0 }
 0x2dd   :  { %v356_v7 = vmax.f32 %v353_v5, 0.0 }
 0x2df   :  { %357 = vst [vmem:[#allocation10] sm:$0xff] %v356_v7 }
 0x2e0   :  { %362 = vsyncadd [#allocation4], 96  ;;  %s696_s10 = smov [#allocation10]  }
 0x2e1   :  { %s363_s13 = sshll.u32 %s696_s10, 4  ;;  %s364_s13 = int_to_ptr.vmem [resolvable:$true] %s363_s13 }
 0x2e2   :  { %s655_s14 = scalar_lea.vmem %s364_s13, 32  ;;  %s659_s4 = scalar_lea.vmem %s364_s13, 128 }
 0x2e3   :  { %p656_p4 = scmp.ne.s32.totalorder %s364_s13, %s655_s14  ;;  %p660_p5 = scmp.lt.s32.totalorder %s364_s13, %s364_s13 }
 0x2e4   :  { %p661_p6 = scmp.lt.s32.totalorder %s659_s4, %s655_s14 }
 0x2e6   :  { %p662_p7 = por %p661_p6, %p660_p5 }
 0x2e8   :  { %p663_p8 = pnand %p662_p7, %p656_p4 }
 0x2ea   :  { %666 = shalt.err (!%p663_p8)
}
 0x2eb   :  { %s667_s6 = scalar_lea.hbm %s856_s7, 32 }
 0x2ec   :  { %p668_p9 = scmp.ne.s32.totalorder %s856_s7, %s667_s6  ;;  %p671_p10 = scmp.lt.u32.totalorder %s667_s6, %s856_s7 }
 0x2ee   :  { %p673_p11 = pnand %p671_p10, %p668_p9 }
 0x2f0   :  { %676 = shalt.err (!%p673_p11)
}
 0x2f1   :  { %369 = dma.vmem_to_hbm [thread:$0]  %s364_s13, 32, %s856_s7, [#allocation4], %s689_s25, %s689_s25, %s690_s26  }
 0x2f2   :  { %683 = dma.done.wait [#allocation4], 128  }
 0x2f3   :  { %684 = vsyncadd [#allocation4], 4294967168 }
 0x2f4   :  { %373 = vsyncpa [#allocation3], 1 }
 0x2f5   :  { %374 = vsyncpa [#allocation6], 1 }
 0x2f6   :  { %375 = vsyncpa [#allocation9], 1 }
 0x2f7   :  { %376 = vsyncpa [#allocation4], 1 }

</bundles_post_ra>
